<compile_context>
chip_gen: v5e
topology: v5e:2x2
jax: 0.10.0
libtpu: 0.0.40
codegen_flags: <defaults>
</compile_context>

<pallas_src>
import functools

import jax
import jax.numpy as jnp
from jax.experimental import pallas as pl
from jax.experimental.pallas import tpu as pltpu

BN_EPS = 1e-5


# -----------------------------------------------------------------------------
# Fused per-layer kernel:
#   p_ref    : (K, 4*M4)  im2col patches, K = KH*KW*Cin, columns ordered
#                         (pool-phase in {0..3}, n, h2, w2)  -- lane-dense
#   w_ref    : (Cout, K)  reshaped conv weights
#   b_ref    : (Cout, 1)  conv bias
#   g_ref    : (Cout, 1)  BN gamma
#   beta_ref : (Cout, 1)  BN beta
#   o_ref    : (Cout, M4) pooled output, M4 = N * (Ho//2) * (Wo//2)
# -----------------------------------------------------------------------------
def _fused_encode_layer_kernel(p_ref, w_ref, b_ref, g_ref, beta_ref, o_ref,
                               *, M4, eps):
    # Conv for the whole batch as ONE MXU matmul: (Cout, K) @ (K, 4*M4).
    y = jnp.dot(w_ref[...], p_ref[...], preferred_element_type=jnp.float32)
    y = y + b_ref[...]                                      # conv bias (Cout, 1) broadcast

    # Training-mode BatchNorm2d statistics over all conv outputs (N, Ho, Wo) per channel.
    # Two-pass mean / variance for numerical stability (no E[x^2]-E[x]^2 cancellation).
    inv_m = 1.0 / (4 * M4)
    mu = jnp.sum(y, axis=1, keepdims=True) * inv_m          # (Cout, 1)   XLU reduce
    d = y - mu
    var = jnp.sum(d * d, axis=1, keepdims=True) * inv_m     # (Cout, 1), biased variance

    scale = g_ref[...] * jax.lax.rsqrt(var + eps)           # (Cout, 1)   EUP rsqrt
    z = jnp.maximum(d * scale + beta_ref[...], 0.0)         # BN affine + ReLU (VPU)

    # MaxPool2d((2,2)): the 4 pooling phases are contiguous, statically-sliced lane blocks
    # of width M4, so the pool is 3 elementwise maxes — no cross-lane shuffles.
    o_ref[...] = jnp.maximum(
        jnp.maximum(z[:, 0 * M4:1 * M4], z[:, 1 * M4:2 * M4]),
        jnp.maximum(z[:, 2 * M4:3 * M4], z[:, 3 * M4:4 * M4]))


def fused_encode_layer(P, W2d, b, gamma, beta, M4, eps):
    Cout, K = W2d.shape
    kern = functools.partial(_fused_encode_layer_kernel, M4=M4, eps=eps)
    vmem = pl.BlockSpec(memory_space=pltpu.MemorySpace.VMEM)
    return pl.pallas_call(
        kern,
        out_shape=jax.ShapeDtypeStruct((Cout, M4), jnp.float32),
        in_specs=[vmem, vmem, vmem, vmem, vmem],
        out_specs=vmem,
    )(P, W2d, b, gamma, beta)


# -----------------------------------------------------------------------------
# EncodeBlock forward in channels-first (C, N, H, W) layout.
# Padding + phase-ordered im2col are thin XLA glue; everything else is in-kernel.
# -----------------------------------------------------------------------------
def encode_block(x_cnhw, params, *, kernel_size, stride, padding, eps=BN_EPS):
    # TODO(synk): only stride=1 convolutions are implemented (this config uses stride 1).
    assert stride == 1
    w, b, gamma, beta = params                 # w: (KH, KW, Cin, Cout) HWIO
    Cin, N, H, W = x_cnhw.shape
    KH, KW, _, Cout = w.shape
    assert KH == kernel_size and KW == kernel_size
    Ho = H + 2 * padding - KH + 1
    Wo = W + 2 * padding - KW + 1
    # TODO(synk): odd conv-output sizes before the 2x2 pool are not handled by the phase
    # decomposition (BN stats would miss the dropped row/col).  Not hit by this config.
    assert Ho % 2 == 0 and Wo % 2 == 0
    H2, W2 = Ho // 2, Wo // 2
    M4 = N * H2 * W2
    K = KH * KW * Cin

    xp = jnp.pad(x_cnhw.astype(jnp.float32),
                 ((0, 0), (0, 0), (padding, padding), (padding, padding)))

    # taps[k, n, h, w] = xp[cin, n, h+kh, w+kw]  with k = (kh*KW + kw)*Cin + cin
    taps = jnp.concatenate(
        [xp[:, :, kh:kh + Ho, kw:kw + Wo] for kh in range(KH) for kw in range(KW)],
        axis=0)                                                  # (K, N, Ho, Wo)

    # Phase-ordered im2col: columns grouped by pooling phase (i, j) in {0,1}^2,
    # within a phase ordered (n, h2, w2).  P: (K, 4*M4)
    P = jnp.concatenate(
        [taps[:, :, i::2, j::2].reshape(K, M4) for i in (0, 1) for j in (0, 1)],
        axis=1)

    W2d = jnp.transpose(w.reshape(K, Cout)).astype(jnp.float32)  # (Cout, K)

    out = fused_encode_layer(P, W2d,
                             b.reshape(Cout, 1).astype(jnp.float32),
                             gamma.reshape(Cout, 1).astype(jnp.float32),
                             beta.reshape(Cout, 1).astype(jnp.float32),
                             M4, eps)                            # (Cout, M4)
    return out.reshape(Cout, N, H2, W2)


def conv_encoder_forward(x_nchw, params, configs):
    x = jnp.transpose(x_nchw, (1, 0, 2, 3)).astype(jnp.float32)   # NCHW -> CNHW
    for p, k, s, pad in zip(params, configs['kernel_sizes'],
                            configs['strides'], configs['paddings']):
        x = encode_block(x, p, kernel_size=k, stride=s, padding=pad)
    return jnp.transpose(x, (1, 0, 2, 3))                         # CNHW -> NCHW


# -----------------------------------------------------------------------------
# Deterministic parameter init (synthetic; PyTorch-like fan-in scaling)
# -----------------------------------------------------------------------------
def init_params(key, configs):
    params = []
    for (cin, cout), k in zip(configs['channels'], configs['kernel_sizes']):
        key, k1, k2, k3, k4 = jax.random.split(key, 5)
        bound = 1.0 / (cin * k * k) ** 0.5
        w = jax.random.uniform(k1, (k, k, cin, cout), jnp.float32, -bound, bound)  # HWIO
        b = jax.random.uniform(k2, (1, cout), jnp.float32, -bound, bound)
        gamma = 1.0 + 0.1 * jax.random.normal(k3, (1, cout), jnp.float32)
        beta = 0.1 * jax.random.normal(k4, (1, cout), jnp.float32)
        params.append((w, b, gamma, beta))
    return params


# -----------------------------------------------------------------------------
# Pure-JAX (XLA) reference for correctness checking
# -----------------------------------------------------------------------------
def reference_forward(x_nchw, params, configs, eps=BN_EPS):
    x = jnp.transpose(x_nchw, (0, 2, 3, 1)).astype(jnp.float32)
    for (w, b, gamma, beta), k, s, p in zip(params, configs['kernel_sizes'],
                                            configs['strides'], configs['paddings']):
        y = jax.lax.conv_general_dilated(
            x, w, (s, s), [(p, p), (p, p)],
            dimension_numbers=('NHWC', 'HWIO', 'NHWC')) + b.reshape(1, 1, 1, -1)
        mu = jnp.mean(y, axis=(0, 1, 2), keepdims=True)
        var = jnp.mean((y - mu) ** 2, axis=(0, 1, 2), keepdims=True)
        y = (y - mu) * jax.lax.rsqrt(var + eps) * gamma.reshape(1, 1, 1, -1) \
            + beta.reshape(1, 1, 1, -1)
        y = jnp.maximum(y, 0.0)
        y = jax.lax.reduce_window(y, -jnp.inf, jax.lax.max,
                                  (1, 2, 2, 1), (1, 2, 2, 1), 'VALID')
        x = y
    return jnp.transpose(x, (0, 3, 1, 2))


# -----------------------------------------------------------------------------
if __name__ == "__main__":
    configs = {
        'channels': [(4, 8), (8, 16)],
        'kernel_sizes': [3, 3],
        'strides': [1, 1],
        'paddings': [1, 1],
        'maxpools': [(2, 2), (2, 2)],   # nn.MaxPool2d((2, 2)) per layer
    }

    key = jax.random.PRNGKey(0)
    key, xkey = jax.random.split(key)
    x = jax.random.normal(xkey, (2, 4, 16, 16), jnp.float32)   # NCHW, like the PyTorch module

    params = init_params(key, configs)

    fwd = jax.jit(lambda xx, pp: conv_encoder_forward(xx, pp, configs))
    out = jax.block_until_ready(fwd(x, params))
    ref = jax.block_until_ready(reference_forward(x, params, configs))

    assert out.shape == (2, 16, 4, 4), out.shape
    max_err = float(jnp.max(jnp.abs(out - ref)))
    assert jnp.allclose(out, ref, rtol=1e-3, atol=1e-3), max_err

    print("KERNEL_OK")
</pallas_src>

<mosaic_0001>
module attributes {stable_mosaic.version = 11 : i64} {
  func.func @_fused_encode_layer_kernel(%arg0: memref<36x512xf32, #tpu.memory_space<vmem>>, %arg1: memref<8x36xf32, #tpu.memory_space<vmem>>, %arg2: memref<8x1xf32, #tpu.memory_space<vmem>>, %arg3: memref<8x1xf32, #tpu.memory_space<vmem>>, %arg4: memref<8x1xf32, #tpu.memory_space<vmem>>, %arg5: memref<8x128xf32, #tpu.memory_space<vmem>>) attributes {dimension_semantics = [], scalar_prefetch = 0 : i64, scratch_operands = 0 : i64, tpu.core_type = #tpu.core_type<tc>} {
    %c0 = arith.constant 0 : index
    %c0_0 = arith.constant 0 : index
    %0 = vector.load %arg1[%c0, %c0_0] : memref<8x36xf32, #tpu.memory_space<vmem>>, vector<8x36xf32>
    %c0_1 = arith.constant 0 : index
    %c0_2 = arith.constant 0 : index
    %1 = vector.load %arg0[%c0_1, %c0_2] : memref<36x512xf32, #tpu.memory_space<vmem>>, vector<36x512xf32>
    %cst = arith.constant dense<0.000000e+00> : vector<8x512xf32>
    %2 = tpu.matmul %0, %1, %cst {dimension_numbers = #tpu.dot_dimension_numbers<[1], [0], [0], [1], [0, 0, 1, 1], [], []>} : vector<8x36xf32>, vector<36x512xf32>, vector<8x512xf32> -> vector<8x512xf32>
    %c0_3 = arith.constant 0 : index
    %c0_4 = arith.constant 0 : index
    %3 = vector.load %arg2[%c0_3, %c0_4] : memref<8x1xf32, #tpu.memory_space<vmem>>, vector<8x1xf32>
    %4 = vector.broadcast %3 : vector<8x1xf32> to vector<8x512xf32>
    %5 = arith.addf %2, %4 : vector<8x512xf32>
    %cst_5 = arith.constant dense<0.000000e+00> : vector<8xf32>
    %6 = vector.multi_reduction <add>, %5, %cst_5 [1] : vector<8x512xf32> to vector<8xf32>
    %7 = vector.shape_cast %6 : vector<8xf32> to vector<8x1xf32>
    %cst_6 = arith.constant 0.001953125 : f32
    %8 = vector.broadcast %cst_6 : f32 to vector<8x1xf32>
    %9 = arith.mulf %7, %8 : vector<8x1xf32>
    %10 = vector.broadcast %9 : vector<8x1xf32> to vector<8x512xf32>
    %11 = arith.subf %5, %10 : vector<8x512xf32>
    %12 = arith.mulf %11, %11 : vector<8x512xf32>
    %cst_7 = arith.constant dense<0.000000e+00> : vector<8xf32>
    %13 = vector.multi_reduction <add>, %12, %cst_7 [1] : vector<8x512xf32> to vector<8xf32>
    %14 = vector.shape_cast %13 : vector<8xf32> to vector<8x1xf32>
    %cst_8 = arith.constant 0.001953125 : f32
    %15 = vector.broadcast %cst_8 : f32 to vector<8x1xf32>
    %16 = arith.mulf %14, %15 : vector<8x1xf32>
    %c0_9 = arith.constant 0 : index
    %c0_10 = arith.constant 0 : index
    %17 = vector.load %arg3[%c0_9, %c0_10] : memref<8x1xf32, #tpu.memory_space<vmem>>, vector<8x1xf32>
    %cst_11 = arith.constant 9.99999974E-6 : f32
    %18 = vector.broadcast %cst_11 : f32 to vector<8x1xf32>
    %19 = arith.addf %16, %18 : vector<8x1xf32>
    %20 = math.rsqrt %19 : vector<8x1xf32>
    %21 = arith.mulf %17, %20 : vector<8x1xf32>
    %22 = vector.broadcast %21 : vector<8x1xf32> to vector<8x512xf32>
    %23 = arith.mulf %11, %22 : vector<8x512xf32>
    %c0_12 = arith.constant 0 : index
    %c0_13 = arith.constant 0 : index
    %24 = vector.load %arg4[%c0_12, %c0_13] : memref<8x1xf32, #tpu.memory_space<vmem>>, vector<8x1xf32>
    %25 = vector.broadcast %24 : vector<8x1xf32> to vector<8x512xf32>
    %26 = arith.addf %23, %25 : vector<8x512xf32>
    %cst_14 = arith.constant 0.000000e+00 : f32
    %27 = vector.broadcast %cst_14 : f32 to vector<8x512xf32>
    %28 = arith.maximumf %26, %27 : vector<8x512xf32>
    %29 = vector.extract_strided_slice %28 {offsets = [0, 0], sizes = [8, 128], strides = [1, 1]} : vector<8x512xf32> to vector<8x128xf32>
    %30 = vector.extract_strided_slice %28 {offsets = [0, 128], sizes = [8, 128], strides = [1, 1]} : vector<8x512xf32> to vector<8x128xf32>
    %31 = arith.maximumf %29, %30 : vector<8x128xf32>
    %32 = vector.extract_strided_slice %28 {offsets = [0, 256], sizes = [8, 128], strides = [1, 1]} : vector<8x512xf32> to vector<8x128xf32>
    %33 = vector.extract_strided_slice %28 {offsets = [0, 384], sizes = [8, 128], strides = [1, 1]} : vector<8x512xf32> to vector<8x128xf32>
    %34 = arith.maximumf %32, %33 : vector<8x128xf32>
    %35 = arith.maximumf %31, %34 : vector<8x128xf32>
    %c0_15 = arith.constant 0 : index
    %c0_16 = arith.constant 0 : index
    %36 = vector.load %arg5[%c0_15, %c0_16] : memref<8x128xf32, #tpu.memory_space<vmem>>, vector<8x128xf32>
    tpu.vector_store %arg5[%c0_15, %c0_16], %35 {strides = array<i32>} : memref<8x128xf32, #tpu.memory_space<vmem>>, vector<8x128xf32>,
    return
  }
}

module attributes {stable_mosaic.version = 11 : i64} {
  func.func @_fused_encode_layer_kernel(%arg0: memref<72x128xf32, #tpu.memory_space<vmem>>, %arg1: memref<16x72xf32, #tpu.memory_space<vmem>>, %arg2: memref<16x1xf32, #tpu.memory_space<vmem>>, %arg3: memref<16x1xf32, #tpu.memory_space<vmem>>, %arg4: memref<16x1xf32, #tpu.memory_space<vmem>>, %arg5: memref<16x32xf32, #tpu.memory_space<vmem>>) attributes {dimension_semantics = [], scalar_prefetch = 0 : i64, scratch_operands = 0 : i64, tpu.core_type = #tpu.core_type<tc>} {
    %c0 = arith.constant 0 : index
    %c0_0 = arith.constant 0 : index
    %0 = vector.load %arg1[%c0, %c0_0] : memref<16x72xf32, #tpu.memory_space<vmem>>, vector<16x72xf32>
    %c0_1 = arith.constant 0 : index
    %c0_2 = arith.constant 0 : index
    %1 = vector.load %arg0[%c0_1, %c0_2] : memref<72x128xf32, #tpu.memory_space<vmem>>, vector<72x128xf32>
    %cst = arith.constant dense<0.000000e+00> : vector<16x128xf32>
    %2 = tpu.matmul %0, %1, %cst {dimension_numbers = #tpu.dot_dimension_numbers<[1], [0], [0], [1], [0, 0, 1, 1], [], []>} : vector<16x72xf32>, vector<72x128xf32>, vector<16x128xf32> -> vector<16x128xf32>
    %c0_3 = arith.constant 0 : index
    %c0_4 = arith.constant 0 : index
    %3 = vector.load %arg2[%c0_3, %c0_4] : memref<16x1xf32, #tpu.memory_space<vmem>>, vector<16x1xf32>
    %4 = vector.broadcast %3 : vector<16x1xf32> to vector<16x128xf32>
    %5 = arith.addf %2, %4 : vector<16x128xf32>
    %cst_5 = arith.constant dense<0.000000e+00> : vector<16xf32>
    %6 = vector.multi_reduction <add>, %5, %cst_5 [1] : vector<16x128xf32> to vector<16xf32>
    %7 = vector.shape_cast %6 : vector<16xf32> to vector<16x1xf32>
    %cst_6 = arith.constant 7.812500e-03 : f32
    %8 = vector.broadcast %cst_6 : f32 to vector<16x1xf32>
    %9 = arith.mulf %7, %8 : vector<16x1xf32>
    %10 = vector.broadcast %9 : vector<16x1xf32> to vector<16x128xf32>
    %11 = arith.subf %5, %10 : vector<16x128xf32>
    %12 = arith.mulf %11, %11 : vector<16x128xf32>
    %cst_7 = arith.constant dense<0.000000e+00> : vector<16xf32>
    %13 = vector.multi_reduction <add>, %12, %cst_7 [1] : vector<16x128xf32> to vector<16xf32>
    %14 = vector.shape_cast %13 : vector<16xf32> to vector<16x1xf32>
    %cst_8 = arith.constant 7.812500e-03 : f32
    %15 = vector.broadcast %cst_8 : f32 to vector<16x1xf32>
    %16 = arith.mulf %14, %15 : vector<16x1xf32>
    %c0_9 = arith.constant 0 : index
    %c0_10 = arith.constant 0 : index
    %17 = vector.load %arg3[%c0_9, %c0_10] : memref<16x1xf32, #tpu.memory_space<vmem>>, vector<16x1xf32>
    %cst_11 = arith.constant 9.99999974E-6 : f32
    %18 = vector.broadcast %cst_11 : f32 to vector<16x1xf32>
    %19 = arith.addf %16, %18 : vector<16x1xf32>
    %20 = math.rsqrt %19 : vector<16x1xf32>
    %21 = arith.mulf %17, %20 : vector<16x1xf32>
    %22 = vector.broadcast %21 : vector<16x1xf32> to vector<16x128xf32>
    %23 = arith.mulf %11, %22 : vector<16x128xf32>
    %c0_12 = arith.constant 0 : index
    %c0_13 = arith.constant 0 : index
    %24 = vector.load %arg4[%c0_12, %c0_13] : memref<16x1xf32, #tpu.memory_space<vmem>>, vector<16x1xf32>
    %25 = vector.broadcast %24 : vector<16x1xf32> to vector<16x128xf32>
    %26 = arith.addf %23, %25 : vector<16x128xf32>
    %cst_14 = arith.constant 0.000000e+00 : f32
    %27 = vector.broadcast %cst_14 : f32 to vector<16x128xf32>
    %28 = arith.maximumf %26, %27 : vector<16x128xf32>
    %29 = vector.extract_strided_slice %28 {offsets = [0, 0], sizes = [16, 32], strides = [1, 1]} : vector<16x128xf32> to vector<16x32xf32>
    %30 = vector.extract_strided_slice %28 {offsets = [0, 32], sizes = [16, 32], strides = [1, 1]} : vector<16x128xf32> to vector<16x32xf32>
    %31 = arith.maximumf %29, %30 : vector<16x32xf32>
    %32 = vector.extract_strided_slice %28 {offsets = [0, 64], sizes = [16, 32], strides = [1, 1]} : vector<16x128xf32> to vector<16x32xf32>
    %33 = vector.extract_strided_slice %28 {offsets = [0, 96], sizes = [16, 32], strides = [1, 1]} : vector<16x128xf32> to vector<16x32xf32>
    %34 = arith.maximumf %32, %33 : vector<16x32xf32>
    %35 = arith.maximumf %31, %34 : vector<16x32xf32>
    %c0_15 = arith.constant 0 : index
    %c0_16 = arith.constant 0 : index
    %36 = vector.load %arg5[%c0_15, %c0_16] : memref<16x32xf32, #tpu.memory_space<vmem>>, vector<16x32xf32>
    tpu.vector_store %arg5[%c0_15, %c0_16], %35 {strides = array<i32>} : memref<16x32xf32, #tpu.memory_space<vmem>>, vector<16x32xf32>,
    return
  }
}

</mosaic_0001>

<bundles_post_ra>
// kernel: _lambda_.2
= control target key start
LH: loop header
LB: loop body
LE: loop exit
PB: predicated region body
PF: predicated region fallthrough
CT: control target
= control target key end

     0   :  { %vm51_vm0 = vcmask 1043456   ;;  %v222_v3 = vmov 0   ;;  %vm47_vm1 = vcmask 293888   ;;  %s328_s0 = inlined_call_operand.vmem [shape: f32[36,512], index: 0, kind: input, shape index: {}]   ;;  %s329_s1 = inlined_call_operand.vmem [shape: f32[8,36], index: 1, kind: input, shape index: {}]   ;;  %s330_s2 = inlined_call_operand.vmem [shape: f32[8,1], index: 2, kind: input, shape index: {}]   ;;  %s331_s4 = inlined_call_operand.vmem [shape: f32[8,1], index: 4, kind: input, shape index: {}]   ;;  %s332_s3 = inlined_call_operand.vmem [shape: f32[8,1], index: 3, kind: input, shape index: {}]   ;;  %s333_s5 = inlined_call_operand.vmem [shape: f32[8,128], index: 5, kind: output, shape index: {}]  }
   0x1   :  { %v39_v0 = vld [vmem:[%s328_s0 + $0x90] sm:$0xf]  ;;  %v40_v1 = vld [vmem:[%s328_s0 + $0x98] sm:$0xf]  ;;  %217 = vset.pattern.permute.xlu0 %v222_v3  ;;  %218 = vset.pattern.permute.xlu1 %v222_v3  ;;  %v37_v5 = vld [vmem:[%s328_s0 + $0x80] sm:$0xf] }
   0x2   :  { %v35_v2 = vld [vmem:[%s328_s0 + $0x70] sm:$0xff]  ;;  %212 = vmatpush.msk.msra.mxu2 %vm51_vm0, %v39_v0  ;;  %214 = vmatpush.msk.msra.mxu3 %vm51_vm0, %v40_v1  ;;  %v36_v4 = vld [vmem:[%s328_s0 + $0x78] sm:$0xff]  ;;  %v38_v6 = vld [vmem:[%s328_s0 + $0x88] sm:$0xf] }
   0x3   :  { %208 = vmatpush.msk.msra.mxu0 %vm51_vm0, %v37_v5  ;;  %210 = vmatpush.msk.msra.mxu1 %vm51_vm0, %v38_v6  ;;  %v31_v7 = vld [vmem:[%s328_s0 + $0x50] sm:$0xff]  ;;  %v32_v8 = vld [vmem:[%s328_s0 + $0x58] sm:$0xff]  ;;  %v33_v9 = vld [vmem:[%s328_s0 + $0x60] sm:$0xff] }
   0x4   :  { %116 = vmatpush.msra.mxu2 %v35_v2  ;;  %136 = vmatpush.msra.mxu3 %v36_v4  ;;  %v34_v10 = vld [vmem:[%s328_s0 + $0x68] sm:$0xff]  ;;  %v27_v11 = vld [vmem:[%s328_s0 + $0x30] sm:$0xff]  ;;  %v28_v12 = vld [vmem:[%s328_s0 + $0x38] sm:$0xff] }
   0x5   :  { %76 = vmatpush.msra.mxu0 %v33_v9  ;;  %96 = vmatpush.msra.mxu1 %v34_v10  ;;  %v29_v13 = vld [vmem:[%s328_s0 + $0x40] sm:$0xff]  ;;  %v30_v14 = vld [vmem:[%s328_s0 + $0x48] sm:$0xff]  ;;  %v23_v16 = vld [vmem:[%s328_s0 + $0x10] sm:$0xff] }
   0x6   :  { %117 = vmatpush.msra.mxu2 %v31_v7  ;;  %137 = vmatpush.msra.mxu3 %v32_v8  ;;  %v25_v15 = vld [vmem:[%s328_s0 + $0x20] sm:$0xff]  ;;  %v24_v17 = vld [vmem:[%s328_s0 + $0x18] sm:$0xff]  ;;  %v26_v18 = vld [vmem:[%s328_s0 + $0x28] sm:$0xff] }
   0x7   :  { %77 = vmatpush.msra.mxu0 %v29_v13  ;;  %97 = vmatpush.msra.mxu1 %v30_v14  ;;  %v20_v19 = vld [vmem:[%s329_s1] sm:$0xff]  ;;  %v22_v21 = vld [vmem:[%s328_s0 + $0x8] sm:$0xff] }
   0x8   :  { %118 = vmatpush.msra.mxu2 %v27_v11  ;;  %138 = vmatpush.msra.mxu3 %v28_v12  ;;  %v21_v20 = vld [vmem:[%s328_s0] sm:$0xff] }
   0x9   :  { %78 = vmatpush.msra.mxu0 %v25_v15  ;;  %98 = vmatpush.msra.mxu1 %v26_v18  ;;  %v41_v22 = vld [vmem:[%s330_s2] sm:$0xff] }
   0xa   :  { %119 = vmatpush.msra.mxu2 %v23_v16  ;;  %139 = vmatpush.msra.mxu3 %v24_v17  ;;  %v186_v48 = vld [vmem:[%s331_s4] sm:$0xff] }
   0xb   :  { %213 = vmatmul.msk.f32.vlgmr.msra.gmra.mxu2 %vm47_vm1, %v20_v19  ;;  %215 = vmatmul.msk.f32.vlgmr.msra.gmra.mxu3 %vm47_vm1, %v20_v19  ;;  %v164_v57 = vld [vmem:[%s332_s3] sm:$0xff] }
   0xc   :  { %79 = vmatpush.msra.mxu0 %v21_v20  ;;  %99 = vmatpush.msra.mxu1 %v22_v21 }
   0xd   :  { %209 = vmatmul.msk.f32.vlgmr.msra.gmra.mxu0 %vm47_vm1, %v20_v19  ;;  %211 = vmatmul.msk.f32.vlgmr.msra.gmra.mxu1 %vm47_vm1, %v20_v19 }
   0xe   :  { %44 = vperm.xlu0 %217, %v41_v22   ;;  %219 = vset.pattern.permute.xlu2 %v222_v3 }
   0xf   :  { %189 = vperm.xlu2 %219, %v186_v48  }
  0x69   :  { %v190_v62 = vpop.permute.xlu2 %189 }
  0x80   :  { %v45_v23 = vpop.permute.xlu0 %44 }
  0x8a   :  { %v81_v24 = vpop.f32.mrf.mxu0  ;;  %v101_v25 = vpop.f32.mrf.mxu1 }
  0x8b   :  { %v82_v26 = vadd.f32 %v81_v24, %v45_v23  ;;  %v102_v27 = vadd.f32 %v101_v25, %v45_v23 }
  0x8d   :  { %v144_v28 = vadd.f32 %v102_v27, %v82_v26 }
  0x8e   :  { %v121_v29 = vpop.f32.mrf.mxu2  ;;  %v141_v30 = vpop.f32.mrf.mxu3 }
  0x8f   :  { %v122_v31 = vadd.f32 %v121_v29, %v45_v23  ;;  %v142_v33 = vadd.f32 %v141_v30, %v45_v23 }
  0x91   :  { %v145_v32 = vadd.f32 %v144_v28, %v122_v31 }
  0x93   :  { %v146_v34 = vadd.f32 %v145_v32, %v142_v33 }
  0x95   :  { %147 = vadd.xlane.f32.xlu0 %v146_v34 }
 0x108   :  { %v148_v35 = vpop.xlane.xlu0 %147 }
 0x109   :  { %v149_v36 = vmul.f32 0.001953125, %v148_v35 }
 0x10b   :  { %v150_v37 = vsub.f32 %v82_v26, %v149_v36  ;;  %v151_v38 = vsub.f32 %v102_v27, %v149_v36  ;;  %v152_v39 = vsub.f32 %v122_v31, %v149_v36  ;;  %v153_v40 = vsub.f32 %v142_v33, %v149_v36 }
 0x10d   :  { %v154_v41 = vmul.f32 %v150_v37, %v150_v37  ;;  %v155_v42 = vmul.f32 %v151_v38, %v151_v38  ;;  %v156_v43 = vmul.f32 %v152_v39, %v152_v39  ;;  %v157_v45 = vmul.f32 %v153_v40, %v153_v40 }
 0x10f   :  { %v158_v44 = vadd.f32 %v155_v42, %v154_v41 }
 0x111   :  { %v159_v46 = vadd.f32 %v158_v44, %v156_v43 }
 0x113   :  { %v160_v47 = vadd.f32 %v159_v46, %v157_v45 }
 0x115   :  { %161 = vadd.xlane.f32.xlu1 %v160_v47 }
 0x188   :  { %v162_v49 = vpop.xlane.xlu1 %161 }
 0x189   :  { %v163_v50 = vmul.f32 0.001953125, %v162_v49 }
 0x18b   :  { %v165_v51 = vadd.f32 1e-05, %v163_v50 }
 0x18d   :  { %220 = vrsqrt.f32 %v165_v51  ;;  %vm172_vm3 = vweird.f32 %v165_v51 }
 0x193   :  { %v221_v52 = vpop.eup %220 }
 0x194   :  { %v167_v53 = vmul.f32 %v221_v52, %v165_v51  ;;  %vm173_vm2 = vweird.f32 %v221_v52 }
 0x195   :  { %vm174_vm4 = vmor %vm172_vm3, %vm173_vm2 }
 0x196   :  { %v168_v54 = vmul.f32 %v221_v52, %v167_v53 }
 0x198   :  { %v169_v55 = vmul.f32 0.5, %v168_v54 }
 0x19a   :  { %v170_v56 = vsub.f32 1.5, %v169_v55 }
 0x19c   :  { %v171_v58 = vmul.f32 %v221_v52, %v170_v56 }
 0x19e   :  { %v175_v59 = vsel %vm174_vm4, %v221_v52, %v171_v58 }
 0x19f   :  { %v176_v60 = vmul.f32 %v175_v59, %v164_v57 }
 0x1a1   :  { %179 = vperm.xlu1 %218, %v176_v60  }
 0x213   :  { %v180_v61 = vpop.permute.xlu1 %179 }
 0x214   :  { %v182_v63 = vmul.f32 %v180_v61, %v150_v37  ;;  %v183_v0 = vmul.f32 %v180_v61, %v151_v38  ;;  %v184_v1 = vmul.f32 %v180_v61, %v152_v39  ;;  %v185_v2 = vmul.f32 %v180_v61, %v153_v40 }
 0x216   :  { %v192_v3 = vadd.f32 %v190_v62, %v182_v63  ;;  %v193_v4 = vadd.f32 %v190_v62, %v183_v0  ;;  %v194_v5 = vadd.f32 %v190_v62, %v184_v1  ;;  %v195_v6 = vadd.f32 %v190_v62, %v185_v2 }
 0x218   :  { %v196_v7 = vmax.f32 %v192_v3, 0.0  ;;  %v197_v8 = vmax.f32 %v193_v4, 0.0  ;;  %v198_v9 = vmax.f32 %v194_v5, 0.0  ;;  %v199_v10 = vmax.f32 %v195_v6, 0.0 }
 0x21a   :  { %v200_v11 = vmax.f32 %v196_v7, %v197_v8  ;;  %v201_v12 = vmax.f32 %v198_v9, %v199_v10 }
 0x21c   :  { %v202_v13 = vmax.f32 %v200_v11, %v201_v12 }
 0x21e   :  { %203 = vst [vmem:[%s333_s5] sm:$0xff] %v202_v13 }

// kernel: _lambda_.3
= control target key start
LH: loop header
LB: loop body
LE: loop exit
PB: predicated region body
PF: predicated region fallthrough
CT: control target
= control target key end

     0   :  { %v191_v2 = vmov 0   ;;  %vm43_vm0 = vcmask 588800   ;;  %s192_s24 = smov 96   ;;  %vm163_vm7 = vcmask 261120   ;;  %s281_s0 = inlined_call_operand.vmem [shape: f32[72,128], index: 0, kind: input, shape index: {}]   ;;  %s282_s2 = inlined_call_operand.vmem [shape: f32[16,1], index: 2, kind: input, shape index: {}]   ;;  %s283_s1 = inlined_call_operand.vmem [shape: f32[16,72], index: 1, kind: input, shape index: {}]   ;;  %s284_s4 = inlined_call_operand.vmem [shape: f32[16,1], index: 4, kind: input, shape index: {}]   ;;  %s285_s3 = inlined_call_operand.vmem [shape: f32[16,1], index: 3, kind: input, shape index: {}]   ;;  %s286_s5 = inlined_call_operand.vmem [shape: f32[16,32], index: 5, kind: output, shape index: {}]  }
   0x1   :  { %v30_v0 = vld [vmem:[%s281_s0 + $0x40] sm:$0xff]  ;;  %v29_v1 = vld [vmem:[%s281_s0 + $0x38] sm:$0xff]  ;;  %184 = vset.pattern.permute.xlu0 %v191_v2  ;;  %185 = vset.pattern.permute.xlu1 %v191_v2  ;;  %v28_v3 = vld [vmem:[%s281_s0 + $0x30] sm:$0xff] }
   0x2   :  { %57 = vmatpush.msra.mxu0 %v30_v0  ;;  %172 = vmatpush.msra.mxu1 %v30_v0  ;;  %v31_v4 = vld [vmem:[%s282_s2] sm:$0xff]  ;;  %v27_v5 = vld [vmem:[%s281_s0 + $0x28] sm:$0xff]  ;;  %v25_v7 = vld [vmem:[%s281_s0 + $0x18] sm:$0xff] }
   0x3   :  { %186 = vset.pattern.permute.xlu2 %v191_v2  ;;  %35 = vperm.xlu0 %184, %v31_v4   ;;  %v26_v6 = vld [vmem:[%s281_s0 + $0x20] sm:$0xff]  ;;  %v32_v8 = vld [vmem:[%s282_s2 + $0x8] sm:$0xff]  ;;  %v24_v9 = vld [vmem:[%s281_s0 + $0x10] sm:$0xff] }
   0x4   :  { %58 = vmatpush.msra.mxu0 %v29_v1  ;;  %173 = vmatpush.msra.mxu1 %v29_v1  ;;  %v23_v10 = vld [vmem:[%s281_s0 + $0x8] sm:$0xff]  ;;  %v22_v11 = vld [vmem:[%s281_s0] sm:$0xff] }
   0x5   :  { %v20_v12 = vld [vmem:[%s283_s1] sm:$0xff]  ;;  %v21_v13 = vld [vmem:[%s283_s1 + $0x8] sm:$0xff] }
   0x6   :  { %59 = vmatpush.msra.mxu0 %v28_v3  ;;  %174 = vmatpush.msra.mxu1 %v28_v3  ;;  %v127_v30 = vld [vmem:[%s284_s4] sm:$0xff]  ;;  %v90_v49 = vld [vmem:[%s285_s3 + $0x8] sm:$0xff] }
   0x7   :  { %v89_v42 = vld [vmem:[%s285_s3] sm:$0xff]  ;;  %v128_v51 = vld [vmem:[%s284_s4 + $0x8] sm:$0xff]  ;;  %s193_s3 = smov 64  }
   0x8   :  { %60 = vmatpush.msra.mxu0 %v27_v5  ;;  %175 = vmatpush.msra.mxu1 %v27_v5 }
   0xa   :  { %61 = vmatpush.msra.mxu0 %v26_v6  ;;  %176 = vmatpush.msra.mxu1 %v26_v6 }
   0xb   :  { %40 = vperm.xlu0 %184, %v32_v8  }
   0xc   :  { %62 = vmatpush.msra.mxu0 %v25_v7  ;;  %177 = vmatpush.msra.mxu1 %v25_v7 }
   0xe   :  { %63 = vmatpush.msra.mxu0 %v24_v9  ;;  %178 = vmatpush.msra.mxu1 %v24_v9 }
  0x10   :  { %64 = vmatpush.msra.mxu0 %v23_v10  ;;  %179 = vmatpush.msra.mxu1 %v23_v10 }
  0x12   :  { %65 = vmatpush.msra.mxu0 %v22_v11  ;;  %180 = vmatpush.msra.mxu1 %v22_v11 }
  0x13   :  { %170 = vmatmul.msk.f32.vlgmr.msra.gmra.mxu0 %vm43_vm0, %v20_v12  ;;  %171 = vmatmul.msk.f32.vlgmr.msra.gmra.mxu1 %vm43_vm0, %v21_v13 }
  0x75   :  { %v36_v14 = vpop.permute.xlu0 %35 }
  0x7d   :  { %v41_v17 = vpop.permute.xlu0 %40 }
  0x90   :  { %v67_v15 = vpop.f32.mrf.mxu0  ;;  %v70_v18 = vpop.f32.mrf.mxu1 }
  0x91   :  { %v68_v16 = vadd.f32 %v67_v15, %v36_v14  ;;  %v71_v19 = vadd.f32 %v70_v18, %v41_v17 }
  0x93   :  { %73 = vadd.xlane.f32.xlu1 %v68_v16 }
  0x9b   :  { %75 = vadd.xlane.f32.xlu1 %v71_v19 }
 0x106   :  { %v74_v20 = vpop.xlane.xlu1 %73 }
 0x107   :  { %v77_v21 = vmul.f32 0.0078125, %v74_v20 }
 0x109   :  { %v79_v22 = vsub.f32 %v68_v16, %v77_v21 }
 0x10b   :  { %v81_v23 = vmul.f32 %v79_v22, %v79_v22 }
 0x10d   :  { %83 = vadd.xlane.f32.xlu2 %v81_v23 }
 0x10e   :  { %v76_v24 = vpop.xlane.xlu1 %75 }
 0x10f   :  { %v78_v25 = vmul.f32 0.0078125, %v76_v24 }
 0x111   :  { %v80_v26 = vsub.f32 %v71_v19, %v78_v25 }
 0x113   :  { %v82_v27 = vmul.f32 %v80_v26, %v80_v26 }
 0x115   :  { %85 = vadd.xlane.f32.xlu2 %v82_v27 }
 0x12d   :  { %131 = vperm.xlu2 %186, %v127_v30  }
 0x180   :  { %v84_v28 = vpop.xlane.xlu2 %83 }
 0x181   :  { %v87_v29 = vmul.f32 0.0078125, %v84_v28 }
 0x183   :  { %v91_v31 = vadd.f32 1e-05, %v87_v29 }
 0x185   :  { %187 = vrsqrt.f32 %v91_v31  ;;  %vm99_vm2 = vweird.f32 %v91_v31 }
 0x188   :  { %v86_v32 = vpop.xlane.xlu2 %85 }
 0x189   :  { %v88_v33 = vmul.f32 0.0078125, %v86_v32 }
 0x18b   :  { %v188_v34 = vpop.eup %187  ;;  %v92_v35 = vadd.f32 1e-05, %v88_v33 }
 0x18c   :  { %v94_v36 = vmul.f32 %v188_v34, %v91_v31  ;;  %vm100_vm1 = vweird.f32 %v188_v34 }
 0x18d   :  { %189 = vrsqrt.f32 %v92_v35  ;;  %vm101_vm3 = vmor %vm99_vm2, %vm100_vm1  ;;  %vm109_vm5 = vweird.f32 %v92_v35 }
 0x18e   :  { %v95_v37 = vmul.f32 %v188_v34, %v94_v36 }
 0x190   :  { %v96_v38 = vmul.f32 0.5, %v95_v37  ;;  %v132_v55 = vpop.permute.xlu2 %131 }
 0x192   :  { %v97_v39 = vsub.f32 1.5, %v96_v38 }
 0x193   :  { %v190_v40 = vpop.eup %189 }
 0x194   :  { %v104_v41 = vmul.f32 %v190_v40, %v92_v35  ;;  %v98_v43 = vmul.f32 %v188_v34, %v97_v39  ;;  %vm110_vm4 = vweird.f32 %v190_v40 }
 0x195   :  { %vm111_vm6 = vmor %vm109_vm5, %vm110_vm4 }
 0x196   :  { %v105_v44 = vmul.f32 %v190_v40, %v104_v41  ;;  %v102_v45 = vsel %vm101_vm3, %v188_v34, %v98_v43 }
 0x197   :  { %v113_v46 = vmul.f32 %v102_v45, %v89_v42 }
 0x198   :  { %v106_v47 = vmul.f32 0.5, %v105_v44 }
 0x199   :  { %117 = vperm.xlu0 %184, %v113_v46  }
 0x19a   :  { %v107_v48 = vsub.f32 1.5, %v106_v47 }
 0x19c   :  { %v108_v50 = vmul.f32 %v190_v40, %v107_v48 }
 0x19e   :  { %v112_v52 = vsel %vm111_vm6, %v190_v40, %v108_v50 }
 0x19f   :  { %v114_v53 = vmul.f32 %v112_v52, %v90_v49 }
 0x1a1   :  { %136 = vperm.xlu0 %184, %v128_v51   ;;  %122 = vperm.xlu1 %185, %v114_v53  }
 0x20b   :  { %v118_v54 = vpop.permute.xlu0 %117 }
 0x20c   :  { %v125_v56 = vmul.f32 %v118_v54, %v79_v22 }
 0x20e   :  { %v139_v57 = vadd.f32 %v132_v55, %v125_v56 }
 0x210   :  { %v141_v58 = vmax.f32 %v139_v57, 0.0 }
 0x212   :  { %145 = vrot.lane.b32.xlu0 %v141_v58, %s192_s24 }
 0x213   :  { %v123_v59 = vpop.permute.xlu1 %122  ;;  %v137_v61 = vpop.permute.xlu0 %136 }
 0x214   :  { %v126_v60 = vmul.f32 %v123_v59, %v80_v26 }
 0x216   :  { %v140_v62 = vadd.f32 %v137_v61, %v126_v60 }
 0x218   :  { %v142_v63 = vmax.f32 %v140_v62, 0.0 }
 0x21a   :  { %147 = vrot.lane.b32.xlu0 %v142_v63, %s192_s24 }
 0x284   :  { %v146_v0 = vpop.permute.xlu0 %145 }
 0x285   :  { %v151_v1 = vmax.f32 %v141_v58, %v146_v0 }
 0x287   :  { %155 = vrot.lane.b32.xlu2 %v151_v1, %s193_s3 }
 0x28c   :  { %v148_v2 = vpop.permute.xlu0 %147 }
 0x28d   :  { %v152_v3 = vmax.f32 %v142_v63, %v148_v2 }
 0x28f   :  { %157 = vrot.lane.b32.xlu1 %v152_v3, %s193_s3 }
 0x2e1   :  { %v156_v4 = vpop.permute.xlu2 %155 }
 0x2e2   :  { %v161_v5 = vmax.f32 %v151_v1, %v156_v4 }
 0x2e4   :  { %164 = vst.msk [vmem:[%s286_s5] sm:$0xff] %vm163_vm7, %v161_v5 }
 0x301   :  { %v158_v6 = vpop.permute.xlu1 %157 }
 0x302   :  { %v162_v7 = vmax.f32 %v152_v3, %v158_v6 }
 0x304   :  { %165 = vst.msk [vmem:[%s286_s5 + $0x8] sm:$0xff] %vm163_vm7, %v162_v7 }

</bundles_post_ra>
